<compile_context>
chip_gen: v7x
topology: tpu7x:2x2x1
jax: 0.10.0
libtpu: 0.0.40
codegen_flags: <defaults>
</compile_context>

<pallas_src>
import jax
import jax.numpy as jnp
from jax.experimental import pallas as pl
from jax.experimental.pallas import tpu as pltpu

_LANES = 128


def _round_up(a: int, b: int) -> int:
    return ((a + b - 1) // b) * b


def crossnet_kernel(x_ref, sw_ref, b_ref, o_ref):
    """One batch tile of the cross-layer stack.

    x_ref  (TB, PD): P original rows packed per 128-lane row.
    sw_ref (L, PD, PD): per-layer block-diagonal weighted-segment matrices in
                        bf16; sw[i, l, j] = kernel_i[l % D] if l//D == j//D
                        else 0.  dot(x_l, sw[i]) computes each packed row's
                        (row . kernel_i) and broadcasts it back across that
                        row's D-lane segment in a single bf16 MXU pass.
    b_ref  (L, PD): per-layer biases (f32), tiled P times along lanes.
    o_ref  (TB, PD)
    """
    x_l = x_ref[...].astype(jnp.float32)                 # f32 accumulate
    num_layers = sw_ref.shape[0]                         # static -> unrolled
    for i in range(num_layers):
        sw = sw_ref[i]                                    # (PD, PD) bf16
        b = b_ref[pl.ds(i, 1), :]                         # (1, PD) f32
        # One bf16 MXU pass (DEFAULT precision), f32 accumulation.  Expected
        # extra error vs a pure-f32 path ~ 2^-9 relative per operand rounding.
        s = jnp.dot(x_l.astype(jnp.bfloat16), sw,
                    preferred_element_type=jnp.float32)
        # Re-read x_0 from VMEM (cheap vld) instead of keeping it live across
        # the whole unrolled layer loop.
        x_l = x_ref[...].astype(jnp.float32) * s + b + x_l
    o_ref[...] = x_l.astype(o_ref.dtype)


def crossnet_forward(x, kernels, biases, *, tile_rows=None,
                     vmem_limit_bytes=48 * 1024 * 1024):
    """CrossNet forward.  x: (B, D); kernels, biases: (L, D)."""
    B, D = x.shape
    L, D2 = kernels.shape
    assert D2 == D and biases.shape == (L, D)

    itemsize = jnp.dtype(x.dtype).itemsize
    if tile_rows is None:
        # Larger tiles for 2-byte I/O (same VMEM footprint, half the HBM bytes).
        tile_rows = 8192 if itemsize <= 2 else 4096

    # ---- lane-dense feature packing / padding -------------------------------
    if D <= _LANES and _LANES % D == 0:
        Dp, P = D, _LANES // D            # P consecutive rows per 128-lane row
    else:
        Dp, P = _round_up(D, _LANES), 1   # zero-pad features to a lane multiple
    PD = P * Dp

    if Dp != D:
        x = jnp.pad(x, ((0, 0), (0, Dp - D)))
        kernels = jnp.pad(kernels, ((0, 0), (0, Dp - D)))
        biases = jnp.pad(biases, ((0, 0), (0, Dp - D)))

    # ---- grid sizing --------------------------------------------------------
    n_packed = pl.cdiv(B, P)              # packed 128-lane rows needed
    # >= ceil(n_packed / tile_rows) steps, and at least 4 steps when the batch
    # is big enough (2 TCs on v7x x double-buffer depth); tb chosen from the
    # step count (not the other way round) to minimize tail padding.
    max_steps = max(1, pl.cdiv(n_packed, 8))
    steps = max(pl.cdiv(n_packed, tile_rows), min(4, max_steps))
    tb = _round_up(pl.cdiv(n_packed, steps), 8)
    n_rows = _round_up(n_packed, tb)
    b_pad = n_rows * P                    # original rows after padding

    xp = x if b_pad == B else jnp.pad(x, ((0, b_pad - B), (0, 0)))
    xp = xp.reshape(n_rows, PD)           # row-major -> free lane packing

    # ---- fold kernels into block-diagonal weighted segment matrices ---------
    lane = jnp.arange(PD)
    seg = lane[:, None] // Dp == lane[None, :] // Dp          # (PD, PD) bool
    kp = jnp.tile(kernels, (1, P))                            # (L, PD)
    segw = jnp.where(seg[None], kp[:, :, None], 0.0).astype(jnp.bfloat16)
    bp = jnp.tile(biases, (1, P)).astype(jnp.float32)         # (L, PD)

    grid = (n_rows // tb,)
    cost = pl.CostEstimate(
        flops=int(L * n_rows * PD * (2 * PD + 4)),            # MXU + elementwise
        transcendentals=0,
        bytes_accessed=int(2 * n_rows * PD * itemsize         # x read + out write
                           + L * PD * PD * 2                  # segw (bf16)
                           + L * PD * 4),                     # biases (f32)
    )

    out = pl.pallas_call(
        crossnet_kernel,
        out_shape=jax.ShapeDtypeStruct((n_rows, PD), x.dtype),
        grid=grid,
        in_specs=[
            pl.BlockSpec((tb, PD), lambda i: (i, 0)),         # x tile (pipelined)
            pl.BlockSpec((L, PD, PD), lambda i: (0, 0, 0)),   # segw (resident)
            pl.BlockSpec((L, PD), lambda i: (0, 0)),          # biases (resident)
        ],
        out_specs=pl.BlockSpec((tb, PD), lambda i: (i, 0)),
        compiler_params=pltpu.CompilerParams(
            dimension_semantics=("parallel",),    # v7x: shard grid over 2 TCs
            vmem_limit_bytes=vmem_limit_bytes,    # 48 MiB fits v5e/v6e/v7x
        ),
        cost_estimate=cost,
    )(xp, segw, bp)

    return out.reshape(b_pad, Dp)[:B, :D]


def crossnet_reference(x, kernels, biases):
    x0 = x
    x_l = x0
    for i in range(kernels.shape[0]):
        s = x_l @ kernels[i][:, None]          # (B, 1)
        x_l = x0 * s + biases[i][None, :] + x_l
    return x_l


if __name__ == "__main__":
    batch = 8
    units = 32            # input_feature_num
    layer_num = 2

    key = jax.random.PRNGKey(0)
    kx, kk, kb = jax.random.split(key, 3)

    x = jax.random.normal(kx, (batch, units), dtype=jnp.float32)

    # Parameter init mirroring the PyTorch module: kernels ~ xavier_normal_ on
    # (units, 1) -> std = sqrt(2/(units+1)).  Biases are zeros at init in the
    # module; small random values are used here so the bias path is exercised.
    xavier_std = jnp.sqrt(2.0 / (units + 1))
    kernels = jax.random.normal(kk, (layer_num, units), dtype=jnp.float32) * xavier_std
    biases = 0.1 * jax.random.normal(kb, (layer_num, units), dtype=jnp.float32)

    # Tolerance derivation: bf16 operand rounding (~2^-9 rel) on x_l and the
    # folded kernel, amplified by dot-product cancellation and 2-layer
    # compounding, bounds the error at ~1e-2 relative / low e-2 absolute for
    # these magnitudes.  Structural (segment/bias mapping) bugs are O(1).
    out = jax.block_until_ready(crossnet_forward(x, kernels, biases))
    ref = crossnet_reference(x, kernels, biases)
    assert out.shape == (batch, units)
    assert jnp.allclose(out, ref, atol=2e-2, rtol=1e-2), "mismatch vs reference"

    # Batch not a multiple of the lane-packing factor: pad/slice path.
    out5 = jax.block_until_ready(crossnet_forward(x[:5], kernels, biases))
    ref5 = crossnet_reference(x[:5], kernels, biases)
    assert out5.shape == (5, units)
    assert jnp.allclose(out5, ref5, atol=2e-2, rtol=1e-2), "mismatch (padded batch)"

    # bf16 I/O path (halves HBM bytes).  Reference uses the rounded inputs so
    # only the kernel's own bf16 math/output-storage error remains.
    xb = x.astype(jnp.bfloat16)
    outb = jax.block_until_ready(crossnet_forward(xb, kernels, biases))
    refb = crossnet_reference(xb.astype(jnp.float32), kernels, biases)
    assert outb.dtype == jnp.bfloat16 and outb.shape == (batch, units)
    assert jnp.allclose(outb.astype(jnp.float32), refb, atol=5e-2, rtol=3e-2), \
        "mismatch (bf16 I/O)"

    # Feature dim that does not divide 128: zero-pad-to-lane path (no masked
    # partial stores).
    units2 = 40
    k2x, k2k, k2b = jax.random.split(jax.random.PRNGKey(1), 3)
    x2 = jax.random.normal(k2x, (batch, units2), dtype=jnp.float32)
    std2 = jnp.sqrt(2.0 / (units2 + 1))
    kernels2 = jax.random.normal(k2k, (layer_num, units2), jnp.float32) * std2
    biases2 = 0.1 * jax.random.normal(k2b, (layer_num, units2), jnp.float32)
    out2 = jax.block_until_ready(crossnet_forward(x2, kernels2, biases2))
    ref2 = crossnet_reference(x2, kernels2, biases2)
    assert out2.shape == (batch, units2)
    assert jnp.allclose(out2, ref2, atol=2e-2, rtol=1e-2), "mismatch (padded D)"

    print("KERNEL_OK")
</pallas_src>

<mosaic_0001>
module attributes {stable_mosaic.version = 11 : i64} {
  func.func @crossnet_kernel(%arg0: i32, %arg1: memref<8x128xf32, #tpu.memory_space<vmem>>, %arg2: memref<2x128x128xbf16, #tpu.memory_space<vmem>>, %arg3: memref<2x128xf32, #tpu.memory_space<vmem>>, %arg4: memref<8x128xf32, #tpu.memory_space<vmem>>) attributes {dimension_semantics = [#tpu.dimension_semantics<parallel>], iteration_bounds = array<i64: 1>, scalar_prefetch = 0 : i64, scratch_operands = 0 : i64, tpu.core_type = #tpu.core_type<tc>, window_params = [{transform_indices = @transform_0, window_bounds = array<i64: 8, 128>}, {pipeline_mode = #tpu.pipeline_mode<synchronous>, transform_indices = @transform_1, window_bounds = array<i64: 2, 128, 128>}, {pipeline_mode = #tpu.pipeline_mode<synchronous>, transform_indices = @transform_2, window_bounds = array<i64: 2, 128>}, {transform_indices = @transform_3, window_bounds = array<i64: 8, 128>}]} {
    %c0 = arith.constant 0 : index
    %c0_0 = arith.constant 0 : index
    %0 = vector.load %arg1[%c0, %c0_0] : memref<8x128xf32, #tpu.memory_space<vmem>>, vector<8x128xf32>
    %c0_1 = arith.constant 0 : index
    %c0_2 = arith.constant 0 : index
    %c0_3 = arith.constant 0 : index
    %1 = vector.load %arg2[%c0_1, %c0_2, %c0_3] : memref<2x128x128xbf16, #tpu.memory_space<vmem>>, vector<1x128x128xbf16>
    %2 = vector.shape_cast %1 : vector<1x128x128xbf16> to vector<128x128xbf16>
    %c0_4 = arith.constant 0 : index
    %c0_5 = arith.constant 0 : index
    %3 = vector.load %arg3[%c0_4, %c0_5] : memref<2x128xf32, #tpu.memory_space<vmem>>, vector<1x128xf32>
    %4 = arith.truncf %0 : vector<8x128xf32> to vector<8x128xbf16>
    %cst = arith.constant dense<0.000000e+00> : vector<8x128xf32>
    %5 = tpu.matmul %4, %2, %cst {dimension_numbers = #tpu.dot_dimension_numbers<[1], [0], [0], [1], [0, 0, 1, 1], [], []>} : vector<8x128xbf16>, vector<128x128xbf16>, vector<8x128xf32> -> vector<8x128xf32>
    %c0_6 = arith.constant 0 : index
    %c0_7 = arith.constant 0 : index
    %6 = vector.load %arg1[%c0_6, %c0_7] : memref<8x128xf32, #tpu.memory_space<vmem>>, vector<8x128xf32>
    %7 = arith.mulf %6, %5 : vector<8x128xf32>
    %8 = vector.broadcast %3 : vector<1x128xf32> to vector<8x128xf32>
    %9 = arith.addf %7, %8 : vector<8x128xf32>
    %10 = arith.addf %9, %0 : vector<8x128xf32>
    %c1 = arith.constant 1 : index
    %c0_8 = arith.constant 0 : index
    %c0_9 = arith.constant 0 : index
    %11 = vector.load %arg2[%c1, %c0_8, %c0_9] : memref<2x128x128xbf16, #tpu.memory_space<vmem>>, vector<1x128x128xbf16>
    %12 = vector.shape_cast %11 : vector<1x128x128xbf16> to vector<128x128xbf16>
    %c1_10 = arith.constant 1 : index
    %c0_11 = arith.constant 0 : index
    %13 = vector.load %arg3[%c1_10, %c0_11] : memref<2x128xf32, #tpu.memory_space<vmem>>, vector<1x128xf32>
    %14 = arith.truncf %10 : vector<8x128xf32> to vector<8x128xbf16>
    %cst_12 = arith.constant dense<0.000000e+00> : vector<8x128xf32>
    %15 = tpu.matmul %14, %12, %cst_12 {dimension_numbers = #tpu.dot_dimension_numbers<[1], [0], [0], [1], [0, 0, 1, 1], [], []>} : vector<8x128xbf16>, vector<128x128xbf16>, vector<8x128xf32> -> vector<8x128xf32>
    %c0_13 = arith.constant 0 : index
    %c0_14 = arith.constant 0 : index
    %16 = vector.load %arg1[%c0_13, %c0_14] : memref<8x128xf32, #tpu.memory_space<vmem>>, vector<8x128xf32>
    %17 = arith.mulf %16, %15 : vector<8x128xf32>
    %18 = vector.broadcast %13 : vector<1x128xf32> to vector<8x128xf32>
    %19 = arith.addf %17, %18 : vector<8x128xf32>
    %20 = arith.addf %19, %10 : vector<8x128xf32>
    %c0_15 = arith.constant 0 : index
    %c0_16 = arith.constant 0 : index
    %21 = vector.load %arg4[%c0_15, %c0_16] : memref<8x128xf32, #tpu.memory_space<vmem>>, vector<8x128xf32>
    tpu.vector_store %arg4[%c0_15, %c0_16], %20 {strides = array<i32>} : memref<8x128xf32, #tpu.memory_space<vmem>>, vector<8x128xf32>,
    return
  }
  func.func @transform_0(%arg0: i32) -> (i32, i32) {
    %c0_i32 = arith.constant 0 : i32
    %c0_i32_0 = arith.constant 0 : i32
    return %arg0, %c0_i32 : i32, i32
  }
  func.func @transform_1(%arg0: i32) -> (i32, i32, i32) {
    %c0_i32 = arith.constant 0 : i32
    %c0_i32_0 = arith.constant 0 : i32
    %c0_i32_1 = arith.constant 0 : i32
    %c0_i32_2 = arith.constant 0 : i32
    return %c0_i32, %c0_i32_0, %c0_i32_1 : i32, i32, i32
  }
  func.func @transform_2(%arg0: i32) -> (i32, i32) {
    %c0_i32 = arith.constant 0 : i32
    %c0_i32_0 = arith.constant 0 : i32
    %c0_i32_1 = arith.constant 0 : i32
    return %c0_i32, %c0_i32_0 : i32, i32
  }
  func.func @transform_3(%arg0: i32) -> (i32, i32) {
    %c0_i32 = arith.constant 0 : i32
    %c0_i32_0 = arith.constant 0 : i32
    return %arg0, %c0_i32 : i32, i32
  }
}

</mosaic_0001>

<bundles_post_ra>
// kernel: tpu_custom_call.1
= control target key start
LH: loop header
LB: loop body
LE: loop exit
PB: predicated region body
PF: predicated region fallthrough
CT: control target
= control target key end

     0   :  { %8 = vsyncpa [#allocation3], 0  ;;  %s534_s0 = inlined_call_operand.hbm [shape: f32[8,128], index: 0, kind: input, shape index: {}]   ;;  %s535_s1 = inlined_call_operand.hbm [shape: bf16[2,128,128], index: 1, kind: input, shape index: {}]   ;;  %s536_s2 = inlined_call_operand.vmem [shape: f32[2,128], index: 2, kind: input, shape index: {}]   ;;  %s537_s3 = inlined_call_operand.hbm [shape: f32[8,128], index: 3, kind: output, shape index: {}]  }
   0x1   :  { %9 = vsyncpa [#allocation6], 0 }
   0x2   :  { %10 = vsyncpa [#allocation4], 0  ;;  %s458_s12 = smov [#allocation2]   ;;  %s459_s14 = smov [#allocation5]  }
   0x3   :  { %s17_s13 = sshll.u32 %s458_s12, 4  ;;  %s26_s15 = sshll.u32 %s459_s14, 4  ;;  %s18_s13 = int_to_ptr.vmem [resolvable:$true] %s17_s13  ;;  %s485_s15 = int_to_ptr.vmem [resolvable:$true] %s26_s15 }
   0x4   :  { %s386_s18 = scalar_lea.hbm %s534_s0, 128 }
   0x5   :  { %p387_p0 = scmp.ne.s32.totalorder %s534_s0, %s386_s18  ;;  %p390_p1 = scmp.lt.u32.totalorder %s386_s18, %s534_s0 }
   0x7   :  { %p392_p2 = pnand %p390_p1, %p387_p0 }
   0x9   :  { %395 = shalt.err (!%p392_p2)
}
   0xa   :  { %s396_s23 = scalar_lea.vmem %s18_s13, 128  ;;  %p401_p4 = scmp.lt.s32.totalorder %s18_s13, %s18_s13 }
   0xb   :  { %p397_p3 = scmp.ne.s32.totalorder %s18_s13, %s396_s23  ;;  %p402_p5 = scmp.lt.s32.totalorder %s396_s23, %s396_s23 }
   0xd   :  { %p403_p6 = por %p402_p5, %p401_p4 }
   0xf   :  { %p404_p7 = pnand %p403_p6, %p397_p3 }
  0x11   :  { %407 = shalt.err (!%p404_p7)
}
  0x12   :  { %20 = dma.hbm_to_vmem [thread:$0]  %s534_s0, 128, %s18_s13, [#allocation3]  }
  0x13   :  { %s408_s28 = scalar_lea.hbm %s535_s1, 2048 }
  0x14   :  { %p409_p8 = scmp.ne.s32.totalorder %s535_s1, %s408_s28  ;;  %p412_p9 = scmp.lt.u32.totalorder %s408_s28, %s535_s1 }
  0x16   :  { %p414_p10 = pnand %p412_p9, %p409_p8 }
  0x18   :  { %417 = shalt.err (!%p414_p10)
}
  0x19   :  { %s418_s6 = scalar_lea.vmem %s485_s15, 2048  ;;  %p423_p12 = scmp.lt.s32.totalorder %s485_s15, %s485_s15 }
  0x1a   :  { %p419_p11 = scmp.ne.s32.totalorder %s485_s15, %s418_s6  ;;  %p424_p13 = scmp.lt.s32.totalorder %s418_s6, %s418_s6 }
  0x1c   :  { %p425_p0 = por %p424_p13, %p423_p12 }
  0x1e   :  { %p426_p1 = pnand %p425_p0, %p419_p11 }
  0x20   :  { %429 = shalt.err (!%p426_p1)
}
  0x21   :  { %s460_s0 = smov 64   ;;  %s461_s7 = smov 4  }
  0x22   :  { %32 = dma.hbm_to_vmem [thread:$0]  %s535_s1, 2048, %s485_s15, [#allocation6], %s460_s0, %s460_s0, %s461_s7  }
  0x23   :  { %452 = dma.done.wait [#allocation3], 128  }
  0x24   :  { %453 = vsyncadd [#allocation3], 4294967168 }
  0x25   :  { %454 = dma.done.wait [#allocation6], 2048  }
  0x26   :  { %455 = vsyncadd [#allocation6], 4294965248  ;;  %v462_v0 = vmov 0.0   ;;  %vm463_vm0 = vmmov 0   ;;  %v370_v1 = vld [vmem:[#allocation5] sm:$0xff]   ;;  %v371_v2 = vld [vmem:[#allocation5 + $0x8] sm:$0xff]  }
  0x27   :  { %323 = vmatprep.subr.bf16.mxu0 %v462_v0  ;;  %339 = vmatprep.mubr.msk.bf16.mxu0 %vm463_vm0, %v462_v0  ;;  %v372_v3 = vld [vmem:[#allocation5 + $0x10] sm:$0xff]   ;;  %v378_v4 = vld [vmem:[#allocation5 + $0x40] sm:$0xff]   ;;  %v373_v5 = vld [vmem:[#allocation5 + $0x18] sm:$0xff]   ;;  %s464_s13 = smov [#allocation7]  }
  0x28   :  { %343 = vmatprep.subr.bf16.mxu1 %v462_v0  ;;  %359 = vmatprep.mubr.msk.bf16.mxu1 %vm463_vm0, %v462_v0  ;;  %v379_v6 = vld [vmem:[#allocation5 + $0x48] sm:$0xff]   ;;  %v374_v7 = vld [vmem:[#allocation5 + $0x20] sm:$0xff]   ;;  %v380_v8 = vld [vmem:[#allocation5 + $0x50] sm:$0xff]   ;;  %s277_s14 = sshll.u32 %s464_s13, 4  ;;  %s278_s14 = int_to_ptr.vmem [resolvable:$true] %s277_s14 }
  0x29   :  { %324 = vmatpush3.bf16.msra.mxu0 %v370_v1  ;;  %344 = vmatpush3.bf16.msra.mxu1 %v378_v4  ;;  %v375_v9 = vld [vmem:[#allocation5 + $0x28] sm:$0xff]   ;;  %v381_v10 = vld [vmem:[#allocation5 + $0x58] sm:$0xff]   ;;  %v376_v11 = vld [vmem:[#allocation5 + $0x30] sm:$0xff]   ;;  %s430_s15 = scalar_lea.vmem %s278_s14, 128  ;;  %p435_p3 = scmp.lt.s32.totalorder %s278_s14, %s278_s14 }
  0x2a   :  { %325 = vmatprep.subr.bf16.mxu0 %v462_v0  ;;  %345 = vmatprep.subr.bf16.mxu1 %v462_v0  ;;  %v382_v12 = vld [vmem:[#allocation5 + $0x60] sm:$0xff]   ;;  %v377_v13 = vld [vmem:[#allocation5 + $0x38] sm:$0xff]   ;;  %v383_v15 = vld [vmem:[#allocation5 + $0x68] sm:$0xff]   ;;  %p431_p2 = scmp.ne.s32.totalorder %s278_s14, %s430_s15  ;;  %p436_p4 = scmp.lt.s32.totalorder %s430_s15, %s430_s15 }
  0x2b   :  { %v42_v14 = vld [vmem:[#allocation2] sm:$0xff]  ;;  %v384_v17 = vld [vmem:[#allocation5 + $0x70] sm:$0xff]  }
  0x2c   :  { %v60_v16 = vpack.c.bf16 %v42_v14, %v42_v14  ;;  %v385_v18 = vld [vmem:[#allocation5 + $0x78] sm:$0xff]   ;;  %p437_p5 = por %p436_p4, %p435_p3 }
  0x2d   :  { %326 = vmatpush3.bf16.msra.mxu0 %v371_v2  ;;  %346 = vmatpush3.bf16.msra.mxu1 %v379_v6  ;;  %v295_v19 = vld [vmem:[%s536_s2] ss:$0 sm:$0xff]  ;;  %v304_v28 = vld [vmem:[%s536_s2 + $0x1] ss:$0 sm:$0xff] }
  0x2e   :  { %327 = vmatprep.subr.bf16.mxu0 %v462_v0  ;;  %347 = vmatprep.subr.bf16.mxu1 %v462_v0  ;;  %p438_p6 = pnand %p437_p5, %p431_p2 }
  0x31   :  { %328 = vmatpush3.bf16.msra.mxu0 %v372_v3  ;;  %348 = vmatpush3.bf16.msra.mxu1 %v380_v8 }
  0x32   :  { %329 = vmatprep.subr.bf16.mxu0 %v462_v0  ;;  %349 = vmatprep.subr.bf16.mxu1 %v462_v0 }
  0x35   :  { %330 = vmatpush3.bf16.msra.mxu0 %v373_v5  ;;  %350 = vmatpush3.bf16.msra.mxu1 %v381_v10 }
  0x36   :  { %331 = vmatprep.subr.bf16.mxu0 %v462_v0  ;;  %351 = vmatprep.subr.bf16.mxu1 %v462_v0 }
  0x39   :  { %332 = vmatpush3.bf16.msra.mxu0 %v374_v7  ;;  %352 = vmatpush3.bf16.msra.mxu1 %v382_v12 }
  0x3a   :  { %333 = vmatprep.subr.bf16.mxu0 %v462_v0  ;;  %353 = vmatprep.subr.bf16.mxu1 %v462_v0 }
  0x3d   :  { %334 = vmatpush3.bf16.msra.mxu0 %v375_v9  ;;  %354 = vmatpush3.bf16.msra.mxu1 %v383_v15 }
  0x3e   :  { %335 = vmatprep.subr.bf16.mxu0 %v462_v0  ;;  %355 = vmatprep.subr.bf16.mxu1 %v462_v0 }
  0x41   :  { %336 = vmatpush3.bf16.msra.mxu0 %v376_v11  ;;  %356 = vmatpush3.bf16.msra.mxu1 %v384_v17 }
  0x42   :  { %337 = vmatprep.subr.bf16.mxu0 %v462_v0  ;;  %357 = vmatprep.subr.bf16.mxu1 %v462_v0 }
  0x45   :  { %338 = vmatpush3.bf16.msra.mxu0 %v377_v13  ;;  %358 = vmatpush3.bf16.msra.mxu1 %v385_v18 }
  0x48   :  { %340 = vmatmul.mubr.bf16.vlgmr.msra.gmra.mrb[0].mxu0 %v60_v16 }
 0x11b   :  { %v143_v20 = vpop.f32.mrb[0].mxu0 }
 0x11c   :  { %v149_v21 = vmul.f32 %v143_v20, %v42_v14  ;;  %v341_v22 = vpop.f32.mrb[1].mxu0 }
 0x11d   :  { %v146_v23 = vpop.f32.mrb[2].mxu0 }
 0x11e   :  { %v154_v24 = vadd.f32 %v295_v19, %v149_v21  ;;  %v342_v25 = vpop.f32.mrb[3].mxu0 }
 0x120   :  { %v155_v26 = vadd.f32 %v154_v24, %v42_v14 }
 0x122   :  { %v174_v27 = vpack.c.bf16 %v155_v26, %v155_v26 }
 0x124   :  { %360 = vmatmul.mubr.bf16.vlgmr.msra.gmra.mrb[0].mxu1 %v174_v27 }
 0x1f7   :  { %v257_v29 = vpop.f32.mrb[0].mxu1 }
 0x1f8   :  { %v263_v30 = vmul.f32 %v257_v29, %v42_v14  ;;  %v361_v31 = vpop.f32.mrb[1].mxu1 }
 0x1f9   :  { %v260_v32 = vpop.f32.mrb[2].mxu1 }
 0x1fa   :  { %v268_v33 = vadd.f32 %v304_v28, %v263_v30  ;;  %v362_v34 = vpop.f32.mrb[3].mxu1 }
 0x1fc   :  { %v269_v35 = vadd.f32 %v268_v33, %v155_v26 }
 0x1fe   :  { %270 = vst [vmem:[#allocation7] sm:$0xff] %v269_v35 }
 0x1ff   :  { %441 = shalt.err (!%p438_p6)
}
 0x200   :  { %s442_s17 = scalar_lea.hbm %s537_s3, 128 }
 0x201   :  { %p443_p7 = scmp.ne.s32.totalorder %s537_s3, %s442_s17  ;;  %p446_p8 = scmp.lt.u32.totalorder %s442_s17, %s537_s3 }
 0x203   :  { %p448_p9 = pnand %p446_p8, %p443_p7 }
 0x205   :  { %451 = shalt.err (!%p448_p9)
}
 0x206   :  { %280 = dma.vmem_to_hbm [thread:$0]  %s278_s14, 128, %s537_s3, [#allocation4]  }
 0x207   :  { %456 = dma.done.wait [#allocation4], 128  }
 0x208   :  { %457 = vsyncadd [#allocation4], 4294967168 }
 0x209   :  { %284 = vsyncpa [#allocation3], 1 }
 0x20a   :  { %285 = vsyncpa [#allocation6], 1 }
 0x20b   :  { %286 = vsyncpa [#allocation4], 1 }

</bundles_post_ra>
